<compile_context>
chip_gen: v7x
topology: tpu7x:2x2x1
jax: 0.10.0
libtpu: 0.0.40
codegen_flags: <defaults>
</compile_context>

<pallas_src>
import numpy as np
import jax
import jax.numpy as jnp
from jax.experimental import pallas as pl
from jax.experimental.pallas import tpu as pltpu

LAYERS = (64, 64, 32, 16)          # kernel is specialized to these sizes
LANE = 128
MAX_TILE_B = 512                   # batch-tile cap (review: 512 >> 128)
SPLIT_B = 512                      # >= 2 grid steps above this (v7x: 2 TCs)
X_TILE_VMEM_BUDGET = 16 * 1024 * 1024   # double-buffered x tile budget

# Row offsets of W1..W4 inside the packed weight blob (8/16-sublane aligned so
# the in-kernel static slices never cross a native tile boundary).
_W_OFFS = (0, 64, 192, 320)
_WBLOB_ROWS = 448


def _round_up(x, m):
    return ((x + m - 1) // m) * m


def dqn_mlp_kernel(x_ref, w0_ref, wblob_ref, bias_ref, out_ref):
    """One batch tile of the fused 5-layer MLP (all params VMEM-resident).

    x_ref     : (TILE_B, F)        activation tile (f32 or bf16)
    w0_ref    : (F, 64)            first-layer weight
    wblob_ref : (448, 128)         W1..W4, each zero-padded to 128 lanes,
                                   stacked at row offsets 0 / 64 / 192 / 320
    bias_ref  : (8, 128)   f32     row i = bias of layer i, zero-padded
    out_ref   : (TILE_B, 128) f32  lane-dense output; cols >= n_actions are 0
    """
    wdt = w0_ref.dtype
    bias = bias_ref[...]

    # layer 0: F -> 64, ReLU
    h = jnp.dot(x_ref[...].astype(wdt), w0_ref[...],
                preferred_element_type=jnp.float32)
    h = jnp.maximum(h + bias[0:1, 0:64], 0.0)                   # (TILE_B, 64)

    # layer 1: 64 -> 64 (lane-padded to 128; padded cols stay exactly 0), ReLU
    h = jnp.dot(h.astype(wdt), wblob_ref[0:64, :],
                preferred_element_type=jnp.float32)
    h = jnp.maximum(h + bias[1:2, :], 0.0)                      # (TILE_B, 128)

    # layer 2: 64 -> 32 (padded), ReLU
    h = jnp.dot(h.astype(wdt), wblob_ref[64:192, :],
                preferred_element_type=jnp.float32)
    h = jnp.maximum(h + bias[2:3, :], 0.0)

    # layer 3: 32 -> 16 (padded), ReLU
    h = jnp.dot(h.astype(wdt), wblob_ref[192:320, :],
                preferred_element_type=jnp.float32)
    h = jnp.maximum(h + bias[3:4, :], 0.0)

    # output layer: 16 -> n_actions (padded to 128 lanes, no activation).
    # Lane-dense store: full 128-lane tile -> unmasked vst; wrapper slices.
    h = jnp.dot(h.astype(wdt), wblob_ref[320:448, :],
                preferred_element_type=jnp.float32)
    out_ref[...] = (h + bias[4:5, :]).astype(out_ref.dtype)


def init_params(key, state_shape, n_actions, layers=LAYERS):
    """U(-1/sqrt(fan_in), 1/sqrt(fan_in)) init matching nn.Linear defaults.

    Weights stored as (in_features, out_features) (transposed vs. PyTorch) so
    the forward is h @ W + b.  Biases stored as (out_features,).
    """
    input_size = int(np.prod(np.array(state_shape)))
    sizes = [input_size] + list(layers) + [n_actions]
    params = []
    for i in range(len(sizes) - 1):
        fan_in, fan_out = sizes[i], sizes[i + 1]
        key, kw, kb = jax.random.split(key, 3)
        bound = 1.0 / np.sqrt(fan_in)
        w = jax.random.uniform(kw, (fan_in, fan_out), jnp.float32, -bound, bound)
        b = jax.random.uniform(kb, (fan_out,), jnp.float32, -bound, bound)
        params.append((w, b))
    return params


def pack_params(params, weight_dtype=jnp.float32):
    """Pack parameters into 3 VMEM-friendly operands:
       - w0:    (F, 64)            first-layer weight
       - wblob: (448, 128)         W1..W4 zero-padded to 128 lanes, stacked at
                                   sublane-aligned row offsets 0/64/192/320
       - bblob: (8, 128)   f32     biases b0..b4, one per row, zero-padded

    weight_dtype defaults to float32 for exact parity with the f32 PyTorch
    module (the kernel is HBM-bound on x, so f32 weights cost ~nothing); pass
    jnp.bfloat16 to halve parameter bytes if lower precision is acceptable.
    """
    assert tuple(w.shape[0] for (w, _) in params[1:]) == LAYERS, \
        "kernel is specialized to hidden layers (64, 64, 32, 16)"
    assert all(w.shape[1] <= LANE for (w, _) in params)

    wblob = jnp.zeros((_WBLOB_ROWS, LANE), weight_dtype)
    for off, (w, _) in zip(_W_OFFS, params[1:]):
        wblob = wblob.at[off:off + w.shape[0], 0:w.shape[1]].set(
            w.astype(weight_dtype))

    bblob = jnp.zeros((8, LANE), jnp.float32)
    for i, (_, b) in enumerate(params):
        bblob = bblob.at[i, 0:b.shape[0]].set(b.astype(jnp.float32))

    return params[0][0].astype(weight_dtype), wblob, bblob


def _choose_tile_b(B, F, x_itemsize):
    """Pick the per-step batch tile.

    - VMEM-aware cap so the double-buffered x tile stays well inside the
      scoped VMEM limit even for very large flattened inputs.
    - Non-8-divisible small batches: one full-extent block (always legal).
    - Batches >= SPLIT_B: at least 2 grid steps so the 'parallel' batch axis
      can shard across both v7x TensorCores (no-op on v5e/v6e).
    """
    vmem_rows = max(8, (X_TILE_VMEM_BUDGET // (2 * F * x_itemsize)) // 8 * 8)
    cap = min(MAX_TILE_B, vmem_rows)
    if B % 8 != 0:
        # Single full-extent block if it fits; otherwise 8-aligned tiles with
        # one ragged tail block (no full-array pad copy in the wrapper).
        return B if B <= cap else cap
    if B >= SPLIT_B:
        return min(cap, _round_up(-(-B // 2), 8))
    return min(cap, B)


def fully_connected_dqn_forward(x_nchw, packed, n_actions):
    """Forward pass. x_nchw: (B, C, H, W), float32 (or bfloat16 straight from
    the producer). Returns (B, n_actions) float32 Q-values."""
    w0, wblob, bblob = packed
    B = x_nchw.shape[0]
    F = int(np.prod(x_nchw.shape[1:]))
    assert w0.shape == (F, LAYERS[0])
    # Flatten only -- no dtype cast here (an un-fused wrapper astype would add
    # a full extra HBM pass; emit bf16 x from the producer if wanted).
    x_flat = jnp.reshape(x_nchw, (B, F))

    tile_b = _choose_tile_b(B, F, x_flat.dtype.itemsize)
    grid = (pl.cdiv(B, tile_b),)

    flops = 2 * B * (F * LAYERS[0] + LAYERS[0] * LANE + 3 * LANE * LANE)
    bytes_accessed = (x_flat.size * x_flat.dtype.itemsize
                      + w0.size * w0.dtype.itemsize
                      + wblob.size * wblob.dtype.itemsize
                      + bblob.size * 4
                      + B * LANE * 4)

    out = pl.pallas_call(
        dqn_mlp_kernel,
        out_shape=jax.ShapeDtypeStruct((B, LANE), jnp.float32),
        grid=grid,
        in_specs=[
            pl.BlockSpec((tile_b, F), lambda i: (i, 0)),   # batch tile of x
            pl.BlockSpec(w0.shape, lambda i: (0, 0)),      # W0, VMEM-resident
            pl.BlockSpec(wblob.shape, lambda i: (0, 0)),   # packed W1..W4
            pl.BlockSpec(bblob.shape, lambda i: (0, 0)),   # packed biases
        ],
        out_specs=pl.BlockSpec((tile_b, LANE), lambda i: (i, 0)),
        compiler_params=pltpu.CompilerParams(
            dimension_semantics=("parallel",)),
        cost_estimate=pl.CostEstimate(
            flops=flops, transcendentals=0, bytes_accessed=bytes_accessed),
    )(x_flat, w0, wblob, bblob)

    # Lane-dense kernel store; slice the real action columns in the wrapper.
    return out[:, :n_actions]


def reference_forward(x_nchw, params):
    """Pure-JAX f32 reference matching the PyTorch module."""
    h = jnp.reshape(x_nchw, (x_nchw.shape[0], -1)).astype(jnp.float32)
    for i, (w, b) in enumerate(params):
        h = jnp.dot(h, w, precision=jax.lax.Precision.HIGHEST) + b
        if i < len(params) - 1:
            h = jnp.maximum(h, 0.0)
    return h


if __name__ == "__main__":
    state_shape = (4, 16, 16)    # (channels, height, width) -> F = 1024
    n_actions = 6
    batch = 2

    key = jax.random.PRNGKey(0)
    key, kx = jax.random.split(key)
    x = jax.random.normal(kx, (batch,) + state_shape, dtype=jnp.float32)

    params = init_params(key, state_shape, n_actions)
    packed = pack_params(params)                      # f32 params by default

    out = fully_connected_dqn_forward(x, packed, n_actions)
    out = jax.block_until_ready(out)
    assert out.shape == (batch, n_actions)

    ref = reference_forward(x, params)
    np.testing.assert_allclose(np.asarray(out), np.asarray(ref),
                               rtol=2e-2, atol=2e-2)

    print("KERNEL_OK")
</pallas_src>

<mosaic_0001>
module attributes {stable_mosaic.version = 11 : i64} {
  func.func @dqn_mlp_kernel(%arg0: i32, %arg1: memref<2x1024xf32, #tpu.memory_space<vmem>>, %arg2: memref<1024x64xf32, #tpu.memory_space<vmem>>, %arg3: memref<448x128xf32, #tpu.memory_space<vmem>>, %arg4: memref<8x128xf32, #tpu.memory_space<vmem>>, %arg5: memref<2x128xf32, #tpu.memory_space<vmem>>) attributes {dimension_semantics = [#tpu.dimension_semantics<parallel>], iteration_bounds = array<i64: 1>, scalar_prefetch = 0 : i64, scratch_operands = 0 : i64, tpu.core_type = #tpu.core_type<tc>, window_params = [{transform_indices = @transform_0, window_bounds = array<i64: 2, 1024>}, {pipeline_mode = #tpu.pipeline_mode<synchronous>, transform_indices = @transform_1, window_bounds = array<i64: 1024, 64>}, {pipeline_mode = #tpu.pipeline_mode<synchronous>, transform_indices = @transform_2, window_bounds = array<i64: 448, 128>}, {pipeline_mode = #tpu.pipeline_mode<synchronous>, transform_indices = @transform_3, window_bounds = array<i64: 8, 128>}, {transform_indices = @transform_4, window_bounds = array<i64: 2, 128>}]} {
    %c0 = arith.constant 0 : index
    %c0_0 = arith.constant 0 : index
    %0 = vector.load %arg4[%c0, %c0_0] : memref<8x128xf32, #tpu.memory_space<vmem>>, vector<8x128xf32>
    %c0_1 = arith.constant 0 : index
    %c0_2 = arith.constant 0 : index
    %1 = vector.load %arg1[%c0_1, %c0_2] : memref<2x1024xf32, #tpu.memory_space<vmem>>, vector<2x1024xf32>
    %c0_3 = arith.constant 0 : index
    %c0_4 = arith.constant 0 : index
    %2 = vector.load %arg2[%c0_3, %c0_4] : memref<1024x64xf32, #tpu.memory_space<vmem>>, vector<1024x64xf32>
    %cst = arith.constant dense<0.000000e+00> : vector<2x64xf32>
    %3 = tpu.matmul %1, %2, %cst {dimension_numbers = #tpu.dot_dimension_numbers<[1], [0], [0], [1], [0, 0, 1, 1], [], []>} : vector<2x1024xf32>, vector<1024x64xf32>, vector<2x64xf32> -> vector<2x64xf32>
    %4 = vector.extract_strided_slice %0 {offsets = [0, 0], sizes = [1, 64], strides = [1, 1]} : vector<8x128xf32> to vector<1x64xf32>
    %5 = vector.broadcast %4 : vector<1x64xf32> to vector<2x64xf32>
    %6 = arith.addf %3, %5 : vector<2x64xf32>
    %cst_5 = arith.constant 0.000000e+00 : f32
    %7 = vector.broadcast %cst_5 : f32 to vector<2x64xf32>
    %8 = arith.maximumf %6, %7 : vector<2x64xf32>
    %c0_6 = arith.constant 0 : index
    %c0_7 = arith.constant 0 : index
    %9 = vector.load %arg3[%c0_6, %c0_7] : memref<448x128xf32, #tpu.memory_space<vmem>>, vector<64x128xf32>
    %cst_8 = arith.constant dense<0.000000e+00> : vector<2x128xf32>
    %10 = tpu.matmul %8, %9, %cst_8 {dimension_numbers = #tpu.dot_dimension_numbers<[1], [0], [0], [1], [0, 0, 1, 1], [], []>} : vector<2x64xf32>, vector<64x128xf32>, vector<2x128xf32> -> vector<2x128xf32>
    %11 = vector.extract_strided_slice %0 {offsets = [1, 0], sizes = [1, 128], strides = [1, 1]} : vector<8x128xf32> to vector<1x128xf32>
    %12 = vector.broadcast %11 : vector<1x128xf32> to vector<2x128xf32>
    %13 = arith.addf %10, %12 : vector<2x128xf32>
    %cst_9 = arith.constant 0.000000e+00 : f32
    %14 = vector.broadcast %cst_9 : f32 to vector<2x128xf32>
    %15 = arith.maximumf %13, %14 : vector<2x128xf32>
    %c64 = arith.constant 64 : index
    %c0_10 = arith.constant 0 : index
    %16 = vector.load %arg3[%c64, %c0_10] : memref<448x128xf32, #tpu.memory_space<vmem>>, vector<128x128xf32>
    %cst_11 = arith.constant dense<0.000000e+00> : vector<2x128xf32>
    %17 = tpu.matmul %15, %16, %cst_11 {dimension_numbers = #tpu.dot_dimension_numbers<[1], [0], [0], [1], [0, 0, 1, 1], [], []>} : vector<2x128xf32>, vector<128x128xf32>, vector<2x128xf32> -> vector<2x128xf32>
    %18 = vector.extract_strided_slice %0 {offsets = [2, 0], sizes = [1, 128], strides = [1, 1]} : vector<8x128xf32> to vector<1x128xf32>
    %19 = vector.broadcast %18 : vector<1x128xf32> to vector<2x128xf32>
    %20 = arith.addf %17, %19 : vector<2x128xf32>
    %cst_12 = arith.constant 0.000000e+00 : f32
    %21 = vector.broadcast %cst_12 : f32 to vector<2x128xf32>
    %22 = arith.maximumf %20, %21 : vector<2x128xf32>
    %c192 = arith.constant 192 : index
    %c0_13 = arith.constant 0 : index
    %23 = vector.load %arg3[%c192, %c0_13] : memref<448x128xf32, #tpu.memory_space<vmem>>, vector<128x128xf32>
    %cst_14 = arith.constant dense<0.000000e+00> : vector<2x128xf32>
    %24 = tpu.matmul %22, %23, %cst_14 {dimension_numbers = #tpu.dot_dimension_numbers<[1], [0], [0], [1], [0, 0, 1, 1], [], []>} : vector<2x128xf32>, vector<128x128xf32>, vector<2x128xf32> -> vector<2x128xf32>
    %25 = vector.extract_strided_slice %0 {offsets = [3, 0], sizes = [1, 128], strides = [1, 1]} : vector<8x128xf32> to vector<1x128xf32>
    %26 = vector.broadcast %25 : vector<1x128xf32> to vector<2x128xf32>
    %27 = arith.addf %24, %26 : vector<2x128xf32>
    %cst_15 = arith.constant 0.000000e+00 : f32
    %28 = vector.broadcast %cst_15 : f32 to vector<2x128xf32>
    %29 = arith.maximumf %27, %28 : vector<2x128xf32>
    %c320 = arith.constant 320 : index
    %c0_16 = arith.constant 0 : index
    %30 = vector.load %arg3[%c320, %c0_16] : memref<448x128xf32, #tpu.memory_space<vmem>>, vector<128x128xf32>
    %cst_17 = arith.constant dense<0.000000e+00> : vector<2x128xf32>
    %31 = tpu.matmul %29, %30, %cst_17 {dimension_numbers = #tpu.dot_dimension_numbers<[1], [0], [0], [1], [0, 0, 1, 1], [], []>} : vector<2x128xf32>, vector<128x128xf32>, vector<2x128xf32> -> vector<2x128xf32>
    %32 = vector.extract_strided_slice %0 {offsets = [4, 0], sizes = [1, 128], strides = [1, 1]} : vector<8x128xf32> to vector<1x128xf32>
    %33 = vector.broadcast %32 : vector<1x128xf32> to vector<2x128xf32>
    %34 = arith.addf %31, %33 : vector<2x128xf32>
    %c0_18 = arith.constant 0 : index
    %c0_19 = arith.constant 0 : index
    %35 = vector.load %arg5[%c0_18, %c0_19] : memref<2x128xf32, #tpu.memory_space<vmem>>, vector<2x128xf32>
    tpu.vector_store %arg5[%c0_18, %c0_19], %34 {strides = array<i32>} : memref<2x128xf32, #tpu.memory_space<vmem>>, vector<2x128xf32>,
    return
  }
  func.func @transform_0(%arg0: i32) -> (i32, i32) {
    %c0_i32 = arith.constant 0 : i32
    %c0_i32_0 = arith.constant 0 : i32
    return %arg0, %c0_i32 : i32, i32
  }
  func.func @transform_1(%arg0: i32) -> (i32, i32) {
    %c0_i32 = arith.constant 0 : i32
    %c0_i32_0 = arith.constant 0 : i32
    %c0_i32_1 = arith.constant 0 : i32
    return %c0_i32, %c0_i32_0 : i32, i32
  }
  func.func @transform_2(%arg0: i32) -> (i32, i32) {
    %c0_i32 = arith.constant 0 : i32
    %c0_i32_0 = arith.constant 0 : i32
    %c0_i32_1 = arith.constant 0 : i32
    return %c0_i32, %c0_i32_0 : i32, i32
  }
  func.func @transform_3(%arg0: i32) -> (i32, i32) {
    %c0_i32 = arith.constant 0 : i32
    %c0_i32_0 = arith.constant 0 : i32
    %c0_i32_1 = arith.constant 0 : i32
    return %c0_i32, %c0_i32_0 : i32, i32
  }
  func.func @transform_4(%arg0: i32) -> (i32, i32) {
    %c0_i32 = arith.constant 0 : i32
    %c0_i32_0 = arith.constant 0 : i32
    return %arg0, %c0_i32 : i32, i32
  }
}

</mosaic_0001>

<bundles_post_ra>
// kernel: tpu_custom_call.1
= control target key start
LH: loop header
LB: loop body
LE: loop exit
PB: predicated region body
PF: predicated region fallthrough
CT: control target
= control target key end

     0   :  { %v149_v47 = vlaneseq  ;;  %v1420_v48 = vmov 1983009808   ;;  %s2085_s0 = inlined_call_operand.vmem [shape: f32[2,1024], index: 0, kind: input, shape index: {}]   ;;  %s2086_s1 = inlined_call_operand.vmem [shape: f32[1024,64], index: 1, kind: input, shape index: {}]   ;;  %s2087_s2 = inlined_call_operand.vmem [shape: f32[448,128], index: 2, kind: input, shape index: {}]   ;;  %s2088_s3 = inlined_call_operand.vmem [shape: f32[8,128], index: 3, kind: input, shape index: {}]   ;;  %s2089_s4 = inlined_call_operand.hbm [shape: f32[2,128], index: 4, kind: output, shape index: {}]  }
   0x1   :  { %v37_v0 = vld [vmem:[%s2086_s1 + $0x80] sm:$0xff]  ;;  %v38_v1 = vld [vmem:[%s2086_s1 + $0x88] sm:$0xff]  ;;  %v39_v11 = vld [vmem:[%s2086_s1 + $0x90] sm:$0xff]  ;;  %v157_v49 = vunpack.c.l.s4 %v1420_v48 }
   0x2   :  { %v21_v2 = vld [vmem:[%s2086_s1] sm:$0xff]  ;;  %v1177_v3 = vpack.c.bf16 %v38_v1, %v37_v0  ;;  %v22_v4 = vld [vmem:[%s2086_s1 + $0x8] sm:$0xff]  ;;  %v40_v13 = vld [vmem:[%s2086_s1 + $0x98] sm:$0xff]  ;;  %v1576_v63 = vshrl.u32 %v149_v47, 7 }
   0x3   :  { %v69_v5 = vld [vmem:[%s2086_s1 + $0x180] sm:$0xff]  ;;  %v70_v6 = vld [vmem:[%s2086_s1 + $0x188] sm:$0xff]  ;;  %v1179_v7 = vpack.c.bf16 %v22_v4, %v21_v2  ;;  %v23_v14 = vld [vmem:[%s2086_s1 + $0x10] sm:$0xff]  ;;  %v1181_v16 = vpack.c.bf16 %v40_v13, %v39_v11  ;;  %v158_v0 = vunpack.c.0.s8 %v157_v49 }
   0x4   :  { %v1209_v8 = vpack.c.bf16 %v70_v6, %v69_v5  ;;  %v53_v9 = vld [vmem:[%s2086_s1 + $0x100] sm:$0xff]  ;;  %v54_v10 = vld [vmem:[%s2086_s1 + $0x108] sm:$0xff]  ;;  %1178 = vmatprep.subr.bf16.mxu0 %v1177_v3  ;;  %v24_v15 = vld [vmem:[%s2086_s1 + $0x18] sm:$0xff] }
   0x5   :  { %v1211_v12 = vpack.c.bf16 %v54_v10, %v53_v9  ;;  %1180 = vmatpush3.bf16.msra.mxu0 %v1179_v7  ;;  %v1183_v17 = vpack.c.bf16 %v24_v15, %v23_v14  ;;  %v71_v18 = vld [vmem:[%s2086_s1 + $0x190] sm:$0xff]  ;;  %v72_v19 = vld [vmem:[%s2086_s1 + $0x198] sm:$0xff]  ;;  %v41_v23 = vld [vmem:[%s2086_s1 + $0xa0] sm:$0xff]  ;;  %v1603_v13 = vsub.s32 %v158_v0, %v1576_v63 }
   0x6   :  { %1210 = vmatprep.subr.bf16.mxu1 %v1209_v8  ;;  %v55_v20 = vld [vmem:[%s2086_s1 + $0x110] sm:$0xff]  ;;  %v1213_v21 = vpack.c.bf16 %v72_v19, %v71_v18  ;;  %v56_v22 = vld [vmem:[%s2086_s1 + $0x118] sm:$0xff]  ;;  %v42_v24 = vld [vmem:[%s2086_s1 + $0xa8] sm:$0xff]  ;;  %1182 = vmatprep.subr.bf16.mxu0 %v1181_v16 }
   0x7   :  { %1212 = vmatpush3.bf16.msra.mxu1 %v1211_v12  ;;  %v1215_v25 = vpack.c.bf16 %v56_v22, %v55_v20  ;;  %v1185_v26 = vpack.c.bf16 %v42_v24, %v41_v23  ;;  %v25_v27 = vld [vmem:[%s2086_s1 + $0x20] sm:$0xff]  ;;  %v26_v28 = vld [vmem:[%s2086_s1 + $0x28] sm:$0xff]  ;;  %v43_v35 = vld [vmem:[%s2086_s1 + $0xb0] sm:$0xff] }
   0x8   :  { %v73_v29 = vld [vmem:[%s2086_s1 + $0x1a0] sm:$0xff]  ;;  %1214 = vmatprep.subr.bf16.mxu1 %v1213_v21  ;;  %v74_v30 = vld [vmem:[%s2086_s1 + $0x1a8] sm:$0xff]  ;;  %v1187_v33 = vpack.c.bf16 %v26_v28, %v25_v27  ;;  %v44_v36 = vld [vmem:[%s2086_s1 + $0xb8] sm:$0xff] }
   0x9   :  { %v57_v31 = vld [vmem:[%s2086_s1 + $0x120] sm:$0xff]  ;;  %v58_v32 = vld [vmem:[%s2086_s1 + $0x128] sm:$0xff]  ;;  %1184 = vmatpush3.bf16.msra.mxu0 %v1183_v17  ;;  %v1217_v34 = vpack.c.bf16 %v74_v30, %v73_v29  ;;  %v27_v37 = vld [vmem:[%s2086_s1 + $0x30] sm:$0xff]  ;;  %v1189_v39 = vpack.c.bf16 %v44_v36, %v43_v35 }
   0xa   :  { %1186 = vmatprep.subr.bf16.mxu0 %v1185_v26  ;;  %v1219_v38 = vpack.c.bf16 %v58_v32, %v57_v31  ;;  %v28_v40 = vld [vmem:[%s2086_s1 + $0x38] sm:$0xff]  ;;  %v75_v41 = vld [vmem:[%s2086_s1 + $0x1b0] sm:$0xff]  ;;  %v45_v46 = vld [vmem:[%s2086_s1 + $0xc0] sm:$0xff] }
   0xb   :  { %1216 = vmatpush3.bf16.msra.mxu1 %v1215_v25  ;;  %v76_v42 = vld [vmem:[%s2086_s1 + $0x1b8] sm:$0xff]  ;;  %v59_v44 = vld [vmem:[%s2086_s1 + $0x130] sm:$0xff]  ;;  %v46_v50 = vld [vmem:[%s2086_s1 + $0xc8] sm:$0xff]  ;;  %v1191_v51 = vpack.c.bf16 %v28_v40, %v27_v37 }
   0xc   :  { %1218 = vmatprep.subr.bf16.mxu1 %v1217_v34  ;;  %v1221_v43 = vpack.c.bf16 %v76_v42, %v75_v41  ;;  %v60_v45 = vld [vmem:[%s2086_s1 + $0x138] sm:$0xff]  ;;  %v77_v52 = vld [vmem:[%s2086_s1 + $0x1c0] sm:$0xff]  ;;  %v78_v53 = vld [vmem:[%s2086_s1 + $0x1c8] sm:$0xff]  ;;  %v1193_v55 = vpack.c.bf16 %v46_v50, %v45_v46 }
   0xd   :  { %1188 = vmatpush3.bf16.msra.mxu0 %v1187_v33  ;;  %v1223_v54 = vpack.c.bf16 %v60_v45, %v59_v44  ;;  %v29_v56 = vld [vmem:[%s2086_s1 + $0x40] sm:$0xff]  ;;  %v30_v57 = vld [vmem:[%s2086_s1 + $0x48] sm:$0xff]  ;;  %v1225_v59 = vpack.c.bf16 %v78_v53, %v77_v52  ;;  %v47_v61 = vld [vmem:[%s2086_s1 + $0xd0] sm:$0xff] }
   0xe   :  { %1190 = vmatprep.subr.bf16.mxu0 %v1189_v39  ;;  %v61_v58 = vld [vmem:[%s2086_s1 + $0x140] sm:$0xff]  ;;  %v62_v60 = vld [vmem:[%s2086_s1 + $0x148] sm:$0xff]  ;;  %v48_v62 = vld [vmem:[%s2086_s1 + $0xd8] sm:$0xff]  ;;  %v1195_v3 = vpack.c.bf16 %v30_v57, %v29_v56 }
   0xf   :  { %1220 = vmatpush3.bf16.msra.mxu1 %v1219_v38  ;;  %v79_v1 = vld [vmem:[%s2086_s1 + $0x1d0] sm:$0xff]  ;;  %v80_v2 = vld [vmem:[%s2086_s1 + $0x1d8] sm:$0xff]  ;;  %v1227_v4 = vpack.c.bf16 %v62_v60, %v61_v58  ;;  %v1197_v5 = vpack.c.bf16 %v48_v62, %v47_v61  ;;  %v49_v11 = vld [vmem:[%s2086_s1 + $0xe0] sm:$0xff] }
  0x10   :  { %1222 = vmatprep.subr.bf16.mxu1 %v1221_v43  ;;  %v31_v6 = vld [vmem:[%s2086_s1 + $0x50] sm:$0xff]  ;;  %v32_v7 = vld [vmem:[%s2086_s1 + $0x58] sm:$0xff]  ;;  %v1229_v9 = vpack.c.bf16 %v80_v2, %v79_v1  ;;  %v50_v12 = vld [vmem:[%s2086_s1 + $0xe8] sm:$0xff] }
  0x11   :  { %1192 = vmatpush3.bf16.msra.mxu0 %v1191_v51  ;;  %v63_v8 = vld [vmem:[%s2086_s1 + $0x150] sm:$0xff]  ;;  %v64_v10 = vld [vmem:[%s2086_s1 + $0x158] sm:$0xff]  ;;  %v81_v14 = vld [vmem:[%s2086_s1 + $0x1e0] sm:$0xff]  ;;  %v1199_v16 = vpack.c.bf16 %v32_v7, %v31_v6  ;;  %v1201_v19 = vpack.c.bf16 %v50_v12, %v49_v11 }
  0x12   :  { %1194 = vmatprep.subr.bf16.mxu0 %v1193_v55  ;;  %v82_v15 = vld [vmem:[%s2086_s1 + $0x1e8] sm:$0xff]  ;;  %v33_v17 = vld [vmem:[%s2086_s1 + $0x60] sm:$0xff]  ;;  %v1231_v18 = vpack.c.bf16 %v64_v10, %v63_v8  ;;  %v51_v25 = vld [vmem:[%s2086_s1 + $0xf0] sm:$0xff] }
  0x13   :  { %1224 = vmatpush3.bf16.msra.mxu1 %v1223_v54  ;;  %v34_v20 = vld [vmem:[%s2086_s1 + $0x68] sm:$0xff]  ;;  %v65_v21 = vld [vmem:[%s2086_s1 + $0x160] sm:$0xff]  ;;  %v1233_v23 = vpack.c.bf16 %v82_v15, %v81_v14  ;;  %v52_v26 = vld [vmem:[%s2086_s1 + $0xf8] sm:$0xff] }
  0x14   :  { %1226 = vmatprep.subr.bf16.mxu1 %v1225_v59  ;;  %v19_v22 = vld [vmem:[%s2085_s0] sm:$0xff]  ;;  %v66_v24 = vld [vmem:[%s2086_s1 + $0x168] sm:$0xff]  ;;  %v83_v29 = vld [vmem:[%s2086_s1 + $0x1f0] sm:$0xff]  ;;  %v1203_v31 = vpack.c.bf16 %v34_v20, %v33_v17  ;;  %v1205_v35 = vpack.c.bf16 %v52_v26, %v51_v25 }
  0x15   :  { %1196 = vmatpush3.bf16.msra.mxu0 %v1195_v3  ;;  %v162_v27 = vrot.slane %v19_v22, %v1603_v13  ;;  %v155_v28 = vcombine.high %v19_v22, %v19_v22  ;;  %v84_v30 = vld [vmem:[%s2086_s1 + $0x1f8] sm:$0xff]  ;;  %v1235_v34 = vpack.c.bf16 %v66_v24, %v65_v21  ;;  %v35_v36 = vld [vmem:[%s2086_s1 + $0x70] sm:$0xff]  ;;  %v101_v41 = vld [vmem:[%s2086_s1 + $0x280] sm:$0xff] }
  0x16   :  { %1198 = vmatprep.subr.bf16.mxu0 %v1197_v5  ;;  %v36_v37 = vld [vmem:[%s2086_s1 + $0x78] sm:$0xff]  ;;  %v67_v38 = vld [vmem:[%s2086_s1 + $0x170] sm:$0xff]  ;;  %v1237_v39 = vpack.c.bf16 %v84_v30, %v83_v29  ;;  %v102_v42 = vld [vmem:[%s2086_s1 + $0x288] sm:$0xff] }
  0x17   :  { %1228 = vmatpush3.bf16.msra.mxu1 %v1227_v4  ;;  %v170_v32 = vcombine.high %v162_v27, %v162_v27  ;;  %v169_v33 = vrot.slane %v155_v28, %v1603_v13  ;;  %v68_v40 = vld [vmem:[%s2086_s1 + $0x178] sm:$0xff]  ;;  %v133_v44 = vld [vmem:[%s2086_s1 + $0x380] sm:$0xff]  ;;  %v134_v45 = vld [vmem:[%s2086_s1 + $0x388] sm:$0xff]  ;;  %v1207_v46 = vpack.c.bf16 %v36_v37, %v35_v36  ;;  %v1241_v48 = vpack.c.bf16 %v102_v42, %v101_v41 }
  0x18   :  { %1230 = vmatprep.subr.bf16.mxu1 %v1229_v9  ;;  %v1239_v47 = vpack.c.bf16 %v68_v40, %v67_v38  ;;  %v85_v49 = vld [vmem:[%s2086_s1 + $0x200] sm:$0xff]  ;;  %v86_v50 = vld [vmem:[%s2086_s1 + $0x208] sm:$0xff]  ;;  %v1273_v52 = vpack.c.bf16 %v134_v45, %v133_v44  ;;  %v103_v54 = vld [vmem:[%s2086_s1 + $0x290] sm:$0xff] }
  0x19   :  { %1200 = vmatpush3.bf16.msra.mxu0 %v1199_v16  ;;  %261 = vmatprep.mubr.f32.mxu0 %v170_v32  ;;  %v171_v43 = vcombine.high %v169_v33, %v169_v33  ;;  %v117_v51 = vld [vmem:[%s2086_s1 + $0x300] sm:$0xff]  ;;  %v118_v53 = vld [vmem:[%s2086_s1 + $0x308] sm:$0xff]  ;;  %v104_v55 = vld [vmem:[%s2086_s1 + $0x298] sm:$0xff]  ;;  %v1243_v58 = vpack.c.bf16 %v86_v50, %v85_v49 }
  0x1a   :  { %1202 = vmatprep.subr.bf16.mxu0 %v1201_v19  ;;  %v135_v56 = vld [vmem:[%s2086_s1 + $0x390] sm:$0xff]  ;;  %v136_v57 = vld [vmem:[%s2086_s1 + $0x398] sm:$0xff]  ;;  %v1275_v59 = vpack.c.bf16 %v118_v53, %v117_v51  ;;  %v1245_v60 = vpack.c.bf16 %v104_v55, %v103_v54  ;;  %v105_v3 = vld [vmem:[%s2086_s1 + $0x2a0] sm:$0xff] }
  0x1b   :  { %1232 = vmatpush3.bf16.msra.mxu1 %v1231_v18  ;;  %331 = vmatprep.mubr.f32.mxu1 %v171_v43  ;;  %v87_v61 = vld [vmem:[%s2086_s1 + $0x210] sm:$0xff]  ;;  %v88_v62 = vld [vmem:[%s2086_s1 + $0x218] sm:$0xff]  ;;  %v1277_v1 = vpack.c.bf16 %v136_v57, %v135_v56  ;;  %v106_v4 = vld [vmem:[%s2086_s1 + $0x2a8] sm:$0xff] }
  0x1c   :  { %1234 = vmatprep.subr.bf16.mxu1 %v1233_v23  ;;  %v119_v0 = vld [vmem:[%s2086_s1 + $0x310] sm:$0xff]  ;;  %v120_v2 = vld [vmem:[%s2086_s1 + $0x318] sm:$0xff]  ;;  %v137_v5 = vld [vmem:[%s2086_s1 + $0x3a0] sm:$0xff]  ;;  %v1247_v7 = vpack.c.bf16 %v88_v62, %v87_v61  ;;  %v1249_v9 = vpack.c.bf16 %v106_v4, %v105_v3 }
  0x1d   :  { %1204 = vmatpush3.bf16.msra.mxu0 %v1203_v31  ;;  %v138_v6 = vld [vmem:[%s2086_s1 + $0x3a8] sm:$0xff]  ;;  %v1279_v8 = vpack.c.bf16 %v120_v2, %v119_v0  ;;  %v89_v10 = vld [vmem:[%s2086_s1 + $0x220] sm:$0xff]  ;;  %v107_v16 = vld [vmem:[%s2086_s1 + $0x2b0] sm:$0xff] }
  0x1e   :  { %1206 = vmatprep.subr.bf16.mxu0 %v1205_v35  ;;  %v90_v11 = vld [vmem:[%s2086_s1 + $0x228] sm:$0xff]  ;;  %v121_v12 = vld [vmem:[%s2086_s1 + $0x320] sm:$0xff]  ;;  %v1281_v14 = vpack.c.bf16 %v138_v6, %v137_v5  ;;  %v108_v17 = vld [vmem:[%s2086_s1 + $0x2b8] sm:$0xff] }
  0x1f   :  { %1236 = vmatpush3.bf16.msra.mxu1 %v1235_v34  ;;  %v122_v15 = vld [vmem:[%s2086_s1 + $0x328] sm:$0xff]  ;;  %v139_v18 = vld [vmem:[%s2086_s1 + $0x3b0] sm:$0xff]  ;;  %v140_v19 = vld [vmem:[%s2086_s1 + $0x3b8] sm:$0xff]  ;;  %v1251_v20 = vpack.c.bf16 %v90_v11, %v89_v10  ;;  %v1253_v23 = vpack.c.bf16 %v108_v17, %v107_v16 }
  0x20   :  { %1238 = vmatprep.subr.bf16.mxu1 %v1237_v39  ;;  %v91_v21 = vld [vmem:[%s2086_s1 + $0x230] sm:$0xff]  ;;  %v1283_v22 = vpack.c.bf16 %v122_v15, %v121_v12  ;;  %v92_v24 = vld [vmem:[%s2086_s1 + $0x238] sm:$0xff]  ;;  %v109_v28 = vld [vmem:[%s2086_s1 + $0x2c0] sm:$0xff] }
  0x21   :  { %1208 = vmatpush3.bf16.msra.mxu0 %v1207_v46  ;;  %v123_v25 = vld [vmem:[%s2086_s1 + $0x330] sm:$0xff]  ;;  %v124_v26 = vld [vmem:[%s2086_s1 + $0x338] sm:$0xff]  ;;  %v110_v29 = vld [vmem:[%s2086_s1 + $0x2c8] sm:$0xff] }
  0x22   :  { %1242 = vmatprep.subr.bf16.mxu0 %v1241_v48  ;;  %v141_v30 = vld [vmem:[%s2086_s1 + $0x3c0] sm:$0xff]  ;;  %v142_v31 = vld [vmem:[%s2086_s1 + $0x3c8] sm:$0xff] }
  0x23   :  { %1240 = vmatpush3.bf16.msra.mxu1 %v1239_v47  ;;  %v20_v32 = vld [vmem:[%s2085_s0 + $0x8] sm:$0xff] }
  0x24   :  { %1274 = vmatprep.subr.bf16.mxu1 %v1273_v52  ;;  %262 = vmatmul.mubr.f32.vlgmr.msra.gmra.mrb[0].mxu0 %v162_v27  ;;  %v1285_v27 = vpack.c.bf16 %v140_v19, %v139_v18 }
  0x25   :  { %1244 = vmatpush3.bf16.msra.mxu0 %v1243_v58 }
  0x26   :  { %332 = vmatmul.mubr.f32.vlgmr.msra.gmra.mrb[0].mxu1 %v169_v33  ;;  %1246 = vmatprep.subr.bf16.mxu0 %v1245_v60 }
  0x27   :  { %1276 = vmatpush3.bf16.msra.mxu1 %v1275_v59 }
  0x28   :  { %1278 = vmatprep.subr.bf16.mxu1 %v1277_v1 }
  0x29   :  { %1248 = vmatpush3.bf16.msra.mxu0 %v1247_v7 }
  0x2a   :  { %1250 = vmatprep.subr.bf16.mxu0 %v1249_v9 }
  0x2b   :  { %1280 = vmatpush3.bf16.msra.mxu1 %v1279_v8 }
  0x2c   :  { %1282 = vmatprep.subr.bf16.mxu1 %v1281_v14 }
  0x2d   :  { %9 = vsyncpa [#allocation3], 0  ;;  %1252 = vmatpush3.bf16.msra.mxu0 %v1251_v20  ;;  %v1255_v33 = vpack.c.bf16 %v92_v24, %v91_v21  ;;  %v1764_v34 = vrot.slane %v20_v32, %v1603_v13  ;;  %v172_v35 = vcombine.high %v20_v32, %v20_v32  ;;  %v1287_v36 = vpack.c.bf16 %v124_v26, %v123_v25  ;;  %v93_v38 = vld [vmem:[%s2086_s1 + $0x240] sm:$0xff]  ;;  %v94_v39 = vld [vmem:[%s2086_s1 + $0x248] sm:$0xff]  ;;  %s1424_s12 = smov [#allocation2]  }
  0x2e   :  { %1254 = vmatprep.subr.bf16.mxu0 %v1253_v23  ;;  %v1257_v37 = vpack.c.bf16 %v110_v29, %v109_v28  ;;  %v125_v40 = vld [vmem:[%s2086_s1 + $0x340] sm:$0xff]  ;;  %v1289_v41 = vpack.c.bf16 %v142_v31, %v141_v30  ;;  %v126_v42 = vld [vmem:[%s2086_s1 + $0x348] sm:$0xff]  ;;  %v111_v43 = vld [vmem:[%s2086_s1 + $0x2d0] sm:$0xff]  ;;  %v1259_v49 = vpack.c.bf16 %v94_v39, %v93_v38  ;;  %v1421_v24 = vmov 0.0|0.0   ;;  %s844_s13 = sshll.u32 %s1424_s12, 4  ;;  %s845_s13 = int_to_ptr.vmem [resolvable:$true] %s844_s13 }
  0x2f   :  { %1284 = vmatpush3.bf16.msra.mxu1 %v1283_v22  ;;  %v112_v44 = vld [vmem:[%s2086_s1 + $0x2d8] sm:$0xff]  ;;  %v187_v45 = vcombine.high %v1764_v34, %v1764_v34  ;;  %v186_v46 = vrot.slane %v172_v35, %v1603_v13  ;;  %v143_v47 = vld [vmem:[%s2086_s1 + $0x3d0] sm:$0xff]  ;;  %v1291_v51 = vpack.c.bf16 %v126_v42, %v125_v40  ;;  %v113_v57 = vld [vmem:[%s2086_s1 + $0x2e0] sm:$0xff]  ;;  %vm1422_vm0 = vmmov 0   ;;  %p1401_p1 = scmp.lt.s32.totalorder %s845_s13, %s845_s13 }
  0x30   :  { %1286 = vmatprep.subr.bf16.mxu1 %v1285_v27  ;;  %v144_v48 = vld [vmem:[%s2086_s1 + $0x3d8] sm:$0xff]  ;;  %v1261_v52 = vpack.c.bf16 %v112_v44, %v111_v43  ;;  %v95_v13 = vld [vmem:[%s2086_s1 + $0x250] sm:$0xff]  ;;  %v114_v58 = vld [vmem:[%s2086_s1 + $0x2e8] sm:$0xff]  ;;  %vm490_vm1 = vcmask 523264  }
  0x31   :  { %1256 = vmatpush3.bf16.msra.mxu0 %v1255_v33  ;;  %401 = vmatprep.mubr.f32.mxu0 %v187_v45  ;;  %v188_v50 = vcombine.high %v186_v46, %v186_v46  ;;  %v96_v53 = vld [vmem:[%s2086_s1 + $0x258] sm:$0xff]  ;;  %v127_v54 = vld [vmem:[%s2086_s1 + $0x350] sm:$0xff]  ;;  %v1293_v55 = vpack.c.bf16 %v144_v48, %v143_v47  ;;  %v145_v59 = vld [vmem:[%s2086_s1 + $0x3e0] sm:$0xff]  ;;  %v1265_v0 = vpack.c.bf16 %v114_v58, %v113_v57 }
  0x32   :  { %1258 = vmatprep.subr.bf16.mxu0 %v1257_v37  ;;  %v128_v56 = vld [vmem:[%s2086_s1 + $0x358] sm:$0xff]  ;;  %v146_v60 = vld [vmem:[%s2086_s1 + $0x3e8] sm:$0xff]  ;;  %v1263_v61 = vpack.c.bf16 %v96_v53, %v95_v13  ;;  %v97_v1 = vld [vmem:[%s2086_s1 + $0x260] sm:$0xff] }
  0x33   :  { %1288 = vmatpush3.bf16.msra.mxu1 %v1287_v36  ;;  %471 = vmatprep.mubr.f32.mxu1 %v188_v50  ;;  %v1295_v62 = vpack.c.bf16 %v128_v56, %v127_v54  ;;  %v98_v2 = vld [vmem:[%s2086_s1 + $0x268] sm:$0xff]  ;;  %v129_v3 = vld [vmem:[%s2086_s1 + $0x360] sm:$0xff]  ;;  %v1297_v4 = vpack.c.bf16 %v146_v60, %v145_v59  ;;  %v115_v6 = vld [vmem:[%s2086_s1 + $0x2f0] sm:$0xff] }
  0x34   :  { %1290 = vmatprep.subr.bf16.mxu1 %v1289_v41  ;;  %v130_v5 = vld [vmem:[%s2086_s1 + $0x368] sm:$0xff]  ;;  %v116_v7 = vld [vmem:[%s2086_s1 + $0x2f8] sm:$0xff]  ;;  %v147_v8 = vld [vmem:[%s2086_s1 + $0x3f0] sm:$0xff]  ;;  %v1267_v10 = vpack.c.bf16 %v98_v2, %v97_v1 }
  0x35   :  { %1260 = vmatpush3.bf16.msra.mxu0 %v1259_v49  ;;  %v148_v9 = vld [vmem:[%s2086_s1 + $0x3f8] sm:$0xff]  ;;  %v1299_v11 = vpack.c.bf16 %v130_v5, %v129_v3  ;;  %v1269_v12 = vpack.c.bf16 %v116_v7, %v115_v6  ;;  %v99_v14 = vld [vmem:[%s2086_s1 + $0x270] sm:$0xff]  ;;  %v478_v21 = vld [vmem:[%s2087_s2] sm:$0xff] }
  0x36   :  { %1262 = vmatprep.subr.bf16.mxu0 %v1261_v52  ;;  %v100_v15 = vld [vmem:[%s2086_s1 + $0x278] sm:$0xff]  ;;  %v1301_v16 = vpack.c.bf16 %v148_v9, %v147_v8  ;;  %v131_v17 = vld [vmem:[%s2086_s1 + $0x370] sm:$0xff]  ;;  %v479_v22 = vld [vmem:[%s2087_s2 + $0x8] sm:$0xff] }
  0x37   :  { %1292 = vmatpush3.bf16.msra.mxu1 %v1291_v51  ;;  %v132_v18 = vld [vmem:[%s2086_s1 + $0x378] sm:$0xff]  ;;  %v1271_v19 = vpack.c.bf16 %v100_v15, %v99_v14  ;;  %v480_v23 = vld [vmem:[%s2087_s2 + $0x10] sm:$0xff]  ;;  %v1306_v25 = vpack.c.bf16 %v479_v22, %v478_v21  ;;  %v482_v28 = vld [vmem:[%s2087_s2 + $0x20] sm:$0xff] }
  0x38   :  { %1294 = vmatprep.subr.bf16.mxu1 %v1293_v55  ;;  %v1303_v20 = vpack.c.bf16 %v132_v18, %v131_v17  ;;  %v481_v26 = vld [vmem:[%s2087_s2 + $0x18] sm:$0xff]  ;;  %v483_v29 = vld [vmem:[%s2087_s2 + $0x28] sm:$0xff]  ;;  %v484_v31 = vld [vmem:[%s2087_s2 + $0x30] sm:$0xff]  ;;  %v151_v55 = vsub.s32 0, %v1576_v63 }
  0x39   :  { %1264 = vmatpush3.bf16.msra.mxu0 %v1263_v61  ;;  %v1309_v27 = vpack.c.bf16 %v481_v26, %v480_v23  ;;  %v1312_v30 = vpack.c.bf16 %v483_v29, %v482_v28  ;;  %v485_v32 = vld [vmem:[%s2087_s2 + $0x38] sm:$0xff]  ;;  %v565_v35 = vld [vmem:[%s2087_s2 + $0x40] sm:$0xff]  ;;  %v566_v36 = vld [vmem:[%s2087_s2 + $0x48] sm:$0xff] }
  0x3a   :  { %1266 = vmatprep.subr.bf16.mxu0 %v1265_v0  ;;  %v1315_v33 = vpack.c.bf16 %v485_v32, %v484_v31  ;;  %v567_v37 = vld [vmem:[%s2087_s2 + $0x50] sm:$0xff]  ;;  %v1318_v38 = vpack.c.bf16 %v566_v36, %v565_v35  ;;  %v568_v39 = vld [vmem:[%s2087_s2 + $0x58] sm:$0xff]  ;;  %v569_v41 = vld [vmem:[%s2087_s2 + $0x60] sm:$0xff] }
  0x3b   :  { %1296 = vmatpush3.bf16.msra.mxu1 %v1295_v62  ;;  %v1321_v40 = vpack.c.bf16 %v568_v39, %v567_v37  ;;  %v570_v42 = vld [vmem:[%s2087_s2 + $0x68] sm:$0xff]  ;;  %v571_v44 = vld [vmem:[%s2087_s2 + $0x70] sm:$0xff]  ;;  %v572_v45 = vld [vmem:[%s2087_s2 + $0x78] sm:$0xff]  ;;  %v488_v39 = vsub.s32 1, %v1576_v63 }
  0x3c   :  { %1298 = vmatprep.subr.bf16.mxu1 %v1297_v4  ;;  %v1324_v43 = vpack.c.bf16 %v570_v42, %v569_v41  ;;  %v573_v47 = vld [vmem:[%s2087_s2 + $0x80] sm:$0xff]  ;;  %v574_v48 = vld [vmem:[%s2087_s2 + $0x88] sm:$0xff]  ;;  %v575_v50 = vld [vmem:[%s2087_s2 + $0x90] sm:$0xff] }
  0x3d   :  { %1268 = vmatpush3.bf16.msra.mxu0 %v1267_v10  ;;  %v1330_v49 = vpack.c.bf16 %v574_v48, %v573_v47  ;;  %v576_v51 = vld [vmem:[%s2087_s2 + $0x98] sm:$0xff]  ;;  %v577_v13 = vld [vmem:[%s2087_s2 + $0xa0] sm:$0xff]  ;;  %v578_v53 = vld [vmem:[%s2087_s2 + $0xa8] sm:$0xff] }
  0x3e   :  { %1270 = vmatprep.subr.bf16.mxu0 %v1269_v12  ;;  %v1333_v52 = vpack.c.bf16 %v576_v51, %v575_v50  ;;  %v1336_v54 = vpack.c.bf16 %v578_v53, %v577_v13  ;;  %v1941_v56 = vld [vmem:[%s2088_s3] sm:$0xff]  ;;  %v579_v12 = vld [vmem:[%s2087_s2 + $0xb0] sm:$0xff]  ;;  %v580_v14 = vld [vmem:[%s2087_s2 + $0xb8] sm:$0xff] }
  0x3f   :  { %1300 = vmatpush3.bf16.msra.mxu1 %v1299_v11  ;;  %v152_v58 = vrot.slane %v1941_v56, %v151_v55  ;;  %v1339_v15 = vpack.c.bf16 %v580_v14, %v579_v12  ;;  %v657_v17 = vld [vmem:[%s2087_s2 + $0xc8] sm:$0xff]  ;;  %v658_v18 = vld [vmem:[%s2087_s2 + $0xd0] sm:$0xff]  ;;  %v660_v22 = vld [vmem:[%s2087_s2 + $0xe0] sm:$0xff] }
  0x40   :  { %1302 = vmatprep.subr.bf16.mxu1 %v1301_v16  ;;  %v656_v16 = vld [vmem:[%s2087_s2 + $0xc0] sm:$0xff]  ;;  %v661_v23 = vld [vmem:[%s2087_s2 + $0xe8] sm:$0xff]  ;;  %v662_v26 = vld [vmem:[%s2087_s2 + $0xf0] sm:$0xff] }
  0x41   :  { %1272 = vmatpush3.bf16.msra.mxu0 %v1271_v19  ;;  %v1342_v19 = vpack.c.bf16 %v657_v17, %v656_v16  ;;  %v664_v29 = vld [vmem:[%s2087_s2 + $0x100] sm:$0xff]  ;;  %v666_v32 = vld [vmem:[%s2087_s2 + $0x110] sm:$0xff]  ;;  %v669_v37 = vld [vmem:[%s2087_s2 + $0x128] sm:$0xff] }
  0x42   :  { %1305 = vmatprep.subr.bf16.mxu0 %v1421_v24  ;;  %v668_v36 = vld [vmem:[%s2087_s2 + $0x120] sm:$0xff]  ;;  %v750_v51 = vld [vmem:[%s2087_s2 + $0x158] sm:$0xff]  ;;  %v752_v53 = vld [vmem:[%s2087_s2 + $0x168] sm:$0xff] }
  0x43   :  { %1304 = vmatpush3.bf16.msra.mxu1 %v1303_v20  ;;  %v659_v20 = vld [vmem:[%s2087_s2 + $0xd8] sm:$0xff]  ;;  %v747_v48 = vld [vmem:[%s2087_s2 + $0x140] sm:$0xff]  ;;  %v753_v55 = vld [vmem:[%s2087_s2 + $0x170] sm:$0xff] }
  0x44   :  { %402 = vmatmul.mubr.f32.vlgmr.msra.gmra.mrb[2].mxu0 %v1764_v34  ;;  %1317 = vmatprep.subr.bf16.mxu1 %v1421_v24  ;;  %v1423_v34 = vmov 0.0   ;;  %v1345_v21 = vpack.c.bf16 %v659_v20, %v658_v18  ;;  %v751_v13 = vld [vmem:[%s2087_s2 + $0x160] sm:$0xff]  ;;  %v762_v12 = vld [vmem:[%s2087_s2 + $0x1b8] sm:$0xff]  ;;  %v765_v20 = vsub.s32 4, %v1576_v63 }
  0x45   :  { %1307 = vmatpush3.bf16.msra.mxu0 %v1306_v25  ;;  %1069 = vmatprep.mubr.msk.f32.mxu0 %vm1422_vm0, %v1423_v34  ;;  %v1348_v25 = vpack.c.bf16 %v661_v23, %v660_v22 }
  0x46   :  { %472 = vmatmul.mubr.f32.vlgmr.msra.gmra.mrb[2].mxu1 %v186_v46  ;;  %1308 = vmatprep.subr.bf16.mxu0 %v1421_v24  ;;  %v1327_v46 = vpack.c.bf16 %v572_v45, %v571_v44  ;;  %v670_v45 = vld [vmem:[%s2087_s2 + $0x130] sm:$0xff] }
  0x47   :  { %1104 = vmatprep.mubr.msk.f32.mxu1 %vm1422_vm0, %v1423_v34  ;;  %1319 = vmatpush3.bf16.msra.mxu1 %v1318_v38  ;;  %v1360_v38 = vpack.c.bf16 %v669_v37, %v668_v36 }
  0x48   :  { %1320 = vmatprep.subr.bf16.mxu1 %v1421_v24 }
  0x49   :  { %1310 = vmatpush3.bf16.msra.mxu0 %v1309_v27  ;;  %v663_v27 = vld [vmem:[%s2087_s2 + $0xf8] sm:$0xff] }
  0x4a   :  { %1311 = vmatprep.subr.bf16.mxu0 %v1421_v24  ;;  %v1351_v28 = vpack.c.bf16 %v663_v27, %v662_v26 }
  0x4b   :  { %1322 = vmatpush3.bf16.msra.mxu1 %v1321_v40  ;;  %v489_v40 = vrot.slane %v1941_v56, %v488_v39 }
  0x4c   :  { %1323 = vmatprep.subr.bf16.mxu1 %v1421_v24 }
  0x4d   :  { %1313 = vmatpush3.bf16.msra.mxu0 %v1312_v30  ;;  %v665_v30 = vld [vmem:[%s2087_s2 + $0x108] sm:$0xff] }
  0x4e   :  { %1314 = vmatprep.subr.bf16.mxu0 %v1421_v24  ;;  %v1354_v31 = vpack.c.bf16 %v665_v30, %v664_v29 }
  0x4f   :  { %1325 = vmatpush3.bf16.msra.mxu1 %v1324_v43 }
  0x50   :  { %1326 = vmatprep.subr.bf16.mxu1 %v1421_v24 }
  0x51   :  { %1316 = vmatpush3.bf16.msra.mxu0 %v1315_v33  ;;  %v667_v33 = vld [vmem:[%s2087_s2 + $0x118] sm:$0xff] }
  0x52   :  { %1341 = vmatprep.subr.bf16.mxu0 %v1421_v24  ;;  %v1357_v35 = vpack.c.bf16 %v667_v33, %v666_v32 }
  0x53   :  { %1328 = vmatpush3.bf16.msra.mxu1 %v1327_v46  ;;  %v671_v46 = vld [vmem:[%s2087_s2 + $0x138] sm:$0xff] }
  0x54   :  { %1329 = vmatprep.subr.bf16.mxu1 %v1421_v24  ;;  %v1363_v47 = vpack.c.bf16 %v671_v46, %v670_v45 }
  0x57   :  { %1331 = vmatpush3.bf16.msra.mxu1 %v1330_v49  ;;  %v748_v49 = vld [vmem:[%s2087_s2 + $0x148] sm:$0xff] }
  0x58   :  { %1332 = vmatprep.subr.bf16.mxu1 %v1421_v24  ;;  %v1366_v50 = vpack.c.bf16 %v748_v49, %v747_v48 }
  0x5b   :  { %1334 = vmatpush3.bf16.msra.mxu1 %v1333_v52 }
  0x5c   :  { %1335 = vmatprep.subr.bf16.mxu1 %v1421_v24 }
  0x5f   :  { %1337 = vmatpush3.bf16.msra.mxu1 %v1336_v54  ;;  %v1372_v54 = vpack.c.bf16 %v752_v53, %v751_v13 }
  0x60   :  { %1338 = vmatprep.subr.bf16.mxu1 %v1421_v24 }
  0x63   :  { %1340 = vmatpush3.bf16.msra.mxu1 %v1339_v15 }
  0x64   :  { %1365 = vmatprep.subr.bf16.mxu1 %v1421_v24 }
  0xf7   :  { %v885_v57 = vpop.f32.mrb[0].mxu0 }
  0xf8   :  { %v886_v59 = vpop.f32.mrb[1].mxu0 }
  0xf9   :  { %v920_v60 = vpop.f32.mrb[0].mxu1  ;;  %v887_v61 = vadd.f32 %v886_v59, %v885_v57  ;;  %v754_v57 = vld [vmem:[%s2087_s2 + $0x178] sm:$0xff]  ;;  %v755_v59 = vld [vmem:[%s2087_s2 + $0x180] sm:$0xff] }
  0xfa   :  { %v921_v62 = vpop.f32.mrb[1].mxu1 }
  0xfb   :  { %v922_v0 = vadd.f32 %v921_v62, %v920_v60  ;;  %v264_v1 = vadd.f32 %v887_v61, %v152_v58  ;;  %v1375_v58 = vpack.c.bf16 %v754_v57, %v753_v55  ;;  %v756_v60 = vld [vmem:[%s2087_s2 + $0x188] sm:$0xff]  ;;  %v757_v62 = vld [vmem:[%s2087_s2 + $0x190] sm:$0xff] }
  0xfc   :  { %v1378_v61 = vpack.c.bf16 %v756_v60, %v755_v59 }
  0xfd   :  { %v334_v2 = vadd.f32 %v922_v0, %v264_v1  ;;  %v758_v0 = vld [vmem:[%s2087_s2 + $0x198] sm:$0xff] }
  0xfe   :  { %v1381_v1 = vpack.c.bf16 %v758_v0, %v757_v62 }
 0x117   :  { %v955_v3 = vpop.f32.mrb[2].mxu0 }
 0x118   :  { %v956_v4 = vpop.f32.mrb[3].mxu0 }
 0x119   :  { %v990_v5 = vpop.f32.mrb[2].mxu1  ;;  %v957_v6 = vadd.f32 %v956_v4, %v955_v3  ;;  %v760_v3 = vld [vmem:[%s2087_s2 + $0x1a8] sm:$0xff] }
 0x11a   :  { %v991_v7 = vpop.f32.mrb[3].mxu1 }
 0x11b   :  { %v992_v8 = vadd.f32 %v991_v7, %v990_v5  ;;  %v404_v9 = vadd.f32 %v957_v6, %v334_v2  ;;  %v759_v2 = vld [vmem:[%s2087_s2 + $0x1a0] sm:$0xff]  ;;  %v583_v5 = vsub.s32 2, %v1576_v63 }
 0x11c   :  { %v1384_v4 = vpack.c.bf16 %v760_v3, %v759_v2 }
 0x11d   :  { %v474_v10 = vadd.f32 %v992_v8, %v404_v9  ;;  %v584_v6 = vrot.slane %v1941_v56, %v583_v5 }
 0x11f   :  { %v477_v11 = vmax.f32 %v474_v10, 0.0 }
 0x121   :  { %1070 = vmatmul.mubr.msk.f32.vlgmr.msra.gmra.mrb[4].mxu0 %vm490_vm1, %v477_v11  ;;  %v761_v11 = vld [vmem:[%s2087_s2 + $0x1b0] sm:$0xff] }
 0x122   :  { %1139 = vmatprep.mubr.msk.f32.mxu0 %vm1422_vm0, %v1423_v34  ;;  %1343 = vmatpush3.bf16.msra.mxu0 %v1342_v19  ;;  %v1387_v14 = vpack.c.bf16 %v762_v12, %v761_v11 }
 0x123   :  { %1344 = vmatprep.subr.bf16.mxu0 %v1421_v24 }
 0x126   :  { %1346 = vmatpush3.bf16.msra.mxu0 %v1345_v21  ;;  %v766_v21 = vrot.slane %v1941_v56, %v765_v20 }
 0x127   :  { %1347 = vmatprep.subr.bf16.mxu0 %v1421_v24 }
 0x12a   :  { %1349 = vmatpush3.bf16.msra.mxu0 %v1348_v25 }
 0x12b   :  { %1350 = vmatprep.subr.bf16.mxu0 %v1421_v24 }
 0x12e   :  { %1352 = vmatpush3.bf16.msra.mxu0 %v1351_v28 }
 0x12f   :  { %1353 = vmatprep.subr.bf16.mxu0 %v1421_v24 }
 0x132   :  { %1355 = vmatpush3.bf16.msra.mxu0 %v1354_v31 }
 0x133   :  { %1356 = vmatprep.subr.bf16.mxu0 %v1421_v24 }
 0x136   :  { %1358 = vmatpush3.bf16.msra.mxu0 %v1357_v35 }
 0x137   :  { %1359 = vmatprep.subr.bf16.mxu0 %v1421_v24 }
 0x13a   :  { %1361 = vmatpush3.bf16.msra.mxu0 %v1360_v38 }
 0x13b   :  { %1362 = vmatprep.subr.bf16.mxu0 %v1421_v24 }
 0x13e   :  { %1364 = vmatpush3.bf16.msra.mxu0 %v1363_v47 }
 0x1f4   :  { %v560_v41 = vpop.f32.mrb[4].mxu0 }
 0x1f5   :  { %v561_v42 = vadd.f32 %v560_v41, %v489_v40  ;;  %v1071_v43 = vpop.f32.mrb[5].mxu0 }
 0x1f7   :  { %v564_v44 = vmax.f32 %v561_v42, 0.0 }
 0x1f9   :  { %1105 = vmatmul.mubr.f32.vlgmr.msra.gmra.mrb[4].mxu1 %v564_v44 }
 0x1fa   :  { %1174 = vmatprep.mubr.msk.f32.mxu1 %vm1422_vm0, %v1423_v34  ;;  %v749_v34 = vld [vmem:[%s2087_s2 + $0x150] sm:$0xff]  ;;  %1367 = vmatpush3.bf16.msra.mxu1 %v1366_v50  ;;  %s1396_s2 = scalar_lea.vmem %s845_s13, 32 }
 0x1fb   :  { %v1369_v52 = vpack.c.bf16 %v750_v51, %v749_v34  ;;  %1368 = vmatprep.subr.bf16.mxu1 %v1421_v24  ;;  %p1397_p0 = scmp.ne.s32.totalorder %s845_s13, %s1396_s2  ;;  %p1402_p2 = scmp.lt.s32.totalorder %s1396_s2, %s1396_s2 }
 0x1fd   :  { %p1403_p3 = por %p1402_p2, %p1401_p1 }
 0x1fe   :  { %1370 = vmatpush3.bf16.msra.mxu1 %v1369_v52 }
 0x1ff   :  { %1371 = vmatprep.subr.bf16.mxu1 %v1421_v24  ;;  %p1404_p4 = pnand %p1403_p3, %p1397_p0 }
 0x202   :  { %1373 = vmatpush3.bf16.msra.mxu1 %v1372_v54 }
 0x203   :  { %1374 = vmatprep.subr.bf16.mxu1 %v1421_v24 }
 0x206   :  { %1376 = vmatpush3.bf16.msra.mxu1 %v1375_v58 }
 0x207   :  { %1377 = vmatprep.subr.bf16.mxu1 %v1421_v24 }
 0x20a   :  { %1379 = vmatpush3.bf16.msra.mxu1 %v1378_v61 }
 0x20b   :  { %1380 = vmatprep.subr.bf16.mxu1 %v1421_v24 }
 0x20e   :  { %1382 = vmatpush3.bf16.msra.mxu1 %v1381_v1 }
 0x20f   :  { %1383 = vmatprep.subr.bf16.mxu1 %v1421_v24 }
 0x212   :  { %1385 = vmatpush3.bf16.msra.mxu1 %v1384_v4 }
 0x213   :  { %1386 = vmatprep.subr.bf16.mxu1 %v1421_v24  ;;  %v674_v24 = vsub.s32 3, %v1576_v63 }
 0x215   :  { %v675_v15 = vrot.slane %v1941_v56, %v674_v24 }
 0x216   :  { %1388 = vmatpush3.bf16.msra.mxu1 %v1387_v14 }
 0x2cc   :  { %v651_v7 = vpop.f32.mrb[4].mxu1 }
 0x2cd   :  { %v652_v8 = vadd.f32 %v651_v7, %v584_v6  ;;  %v1106_v9 = vpop.f32.mrb[5].mxu1 }
 0x2cf   :  { %v655_v10 = vmax.f32 %v652_v8, 0.0 }
 0x2d1   :  { %1140 = vmatmul.mubr.f32.vlgmr.msra.gmra.mrb[6].mxu0 %v655_v10 }
 0x3a4   :  { %v742_v16 = vpop.f32.mrb[6].mxu0 }
 0x3a5   :  { %v743_v17 = vadd.f32 %v742_v16, %v675_v15  ;;  %v1141_v18 = vpop.f32.mrb[7].mxu0 }
 0x3a7   :  { %v746_v19 = vmax.f32 %v743_v17, 0.0 }
 0x3a9   :  { %1175 = vmatmul.mubr.f32.vlgmr.msra.gmra.mrb[6].mxu1 %v746_v19 }
 0x47c   :  { %v833_v22 = vpop.f32.mrb[6].mxu1 }
 0x47d   :  { %v834_v23 = vadd.f32 %v833_v22, %v766_v21  ;;  %v1176_v25 = vpop.f32.mrb[7].mxu1 }
 0x47f   :  { %837 = vst [vmem:[#allocation2] sm:$0x3] %v834_v23 }
 0x480   :  { %1407 = shalt.err (!%p1404_p4)
}
 0x481   :  { %s1408_s15 = scalar_lea.hbm %s2089_s4, 32 }
 0x482   :  { %p1409_p5 = scmp.ne.s32.totalorder %s2089_s4, %s1408_s15  ;;  %p1412_p6 = scmp.lt.u32.totalorder %s1408_s15, %s2089_s4 }
 0x484   :  { %p1414_p7 = pnand %p1412_p6, %p1409_p5 }
 0x486   :  { %1417 = shalt.err (!%p1414_p7)
}
 0x487   :  { %847 = dma.vmem_to_hbm [thread:$0]  %s845_s13, 32, %s2089_s4, [#allocation3]  }
 0x488   :  { %1418 = dma.done.wait [#allocation3], 32  }
 0x489   :  { %1419 = vsyncadd [#allocation3], 4294967264 }
 0x48a   :  { %851 = vsyncpa [#allocation3], 1 }

</bundles_post_ra>
